<compile_context>
chip_gen: v7x
topology: tpu7x:2x2x1
jax: 0.10.0
libtpu: 0.0.40
codegen_flags: <defaults>
</compile_context>

<pallas_src>
import functools

import jax
import jax.numpy as jnp
from jax import lax
from jax.experimental import pallas as pl
from jax.experimental.pallas import tpu as pltpu

_LANES = 128
_FOLD = 32  # accumulator rows (4 independent (8,128) partial accumulators)


def _focal_loss_kernel(x_ref, t_ref, out_ref, acc_ref, *,
                       gamma, sub_rows, n_sub, tile_rows, steps_per_chunk,
                       full_rows, rem_lanes, need_mask, approx_recip):
    c = pl.program_id(0)   # outer "parallel" chunk (two-TC split on v7x)
    s = pl.program_id(1)   # inner "arbitrary" reduction axis within the chunk

    @pl.when(s == 0)
    def _():
        acc_ref[...] = jnp.zeros_like(acc_ref)

    row_base = (c * steps_per_chunk + s) * tile_rows
    g = float(gamma)

    if need_mask:  # hoisted broadcasts (JAX does not CSE broadcast_in_dim in loops)
        row_iota = lax.broadcasted_iota(jnp.int32, (sub_rows, _LANES), 0)
        lane_iota = lax.broadcasted_iota(jnp.int32, (sub_rows, _LANES), 1)

    # Strip-mine the DMA block into sub_rows-row slices to limit live vregs / spills.
    for j in range(n_sub):
        r0 = j * sub_rows  # static, (8,128)-aligned slice start
        x = x_ref[pl.ds(r0, sub_rows), :].astype(jnp.float32)
        t = t_ref[pl.ds(r0, sub_rows), :].astype(jnp.float32)

        # Hard targets t in {0,1}: with z = (2t-1)*x,
        #   BCEWithLogits(x, t) = max(-z, 0) + log1p(exp(-|z|))
        #   pt = exp(-BCE)      = sigmoid(z)
        # -> one exp + one log1p + one reciprocal per element; no float pow.
        # TODO(synk): soft (non-binary) targets need the general
        #             max(x,0) - x*t + log1p(exp(-|x|)) / exp(-bce) path.
        z = (2.0 * t - 1.0) * x
        e = jnp.exp(-jnp.abs(z))
        bce = jnp.maximum(-z, 0.0) + jnp.log1p(e)
        num = jnp.where(z >= 0.0, 1.0, e)
        if approx_recip:
            pt = num * pl.reciprocal(1.0 + e, approx=True)
        else:
            pt = num / (1.0 + e)

        one_minus_pt = jnp.maximum(1.0 - pt, 0.0)  # clamp: approx recip may push pt>1
        if g == 2.0:
            focal_w = one_minus_pt * one_minus_pt            # VPU multiply, no EUP
        elif float(g).is_integer():
            focal_w = lax.integer_pow(one_minus_pt, int(g))  # repeated multiplies
        else:
            focal_w = one_minus_pt ** g                      # generic float gamma
        f = focal_w * bce  # scalar `weights` folded into the wrapper's final scale

        if need_mask:
            rid = row_iota + (row_base + r0)
            valid = (rid < full_rows) | ((rid == full_rows) & (lane_iota < rem_lanes))
            f = jnp.where(valid, f, 0.0)

        # Fold (sub_rows,128) -> (sub_rows//32, 32, 128), sum over axis 0: pure VPU
        # vreg adds into 4 independent (8,128) accumulator lanes (shorter add chain).
        acc_ref[...] += jnp.sum(f.reshape(sub_rows // _FOLD, _FOLD, _LANES), axis=0)

    @pl.when(s == pl.num_programs(1) - 1)
    def _():
        out_ref[...] = acc_ref[...]


def _round_up(x, m):
    return (x + m - 1) // m * m


def focal_loss(inputs, targets, *, weights=1.0, gamma=2.0, logits=True, reduce=True,
               max_tile_rows=2048, sub_rows=256, approx_reciprocal=True):
    """Pallas TPU implementation of FocalLoss.forward (logits=True, reduce=True path).

    Inputs/targets are streamed in the dtype the caller provides (produce bf16 logits /
    narrow targets upstream to cut HBM traffic); the kernel upcasts to f32 internally.
    """
    if not logits:
        raise NotImplementedError("only the logits=True path is implemented")
        # TODO(synk): logits=False would take probabilities and use plain BCE.
    if not reduce:
        raise NotImplementedError("only the reduce=True (mean) path is implemented")
        # TODO(synk): reduce=False would return the per-element loss map.
    assert inputs.shape == targets.shape, (inputs.shape, targets.shape)
    if tuple(getattr(weights, "shape", ())) not in ((), (1,)):
        raise NotImplementedError("only a scalar `weights` is supported")
        # TODO(synk): per-class weight tensors would need a broadcast weight input.
    w = float(weights)

    n_total = int(inputs.size)
    assert n_total > 0

    # Normalize tiling knobs: multiples of the 32-row accumulator fold.
    sub_rows = max(_FOLD, (int(sub_rows) // _FOLD) * _FOLD)
    max_tile_rows = max(sub_rows, (int(max_tile_rows) // sub_rows) * sub_rows)

    rows_raw = -(-n_total // _LANES)
    rows_min = _round_up(rows_raw, _FOLD)

    if rows_min <= max_tile_rows:
        # Small input: one chunk, one grid step, block = whole (padded) array.
        tile_rows = rows_min
        sub = sub_rows
        while tile_rows % sub or sub % _FOLD:
            sub -= _FOLD
            if sub <= _FOLD:
                sub = _FOLD
                break
        n_chunks, steps_per_chunk = 1, 1
        rows_padded = tile_rows
    else:
        # Large input: fixed lane-dense tiles; pad the step count to an even number so
        # both v7x TensorCores get a chunk (harmless serial loop on v5e/v6e).
        tile_rows = max_tile_rows
        sub = sub_rows
        steps = _round_up(-(-rows_raw // tile_rows), 2)
        n_chunks, steps_per_chunk = 2, steps // 2
        rows_padded = steps * tile_rows

    n_sub = tile_rows // sub
    pad_elems = rows_padded * _LANES - n_total

    flat_x = inputs.reshape(-1)
    flat_t = targets.reshape(-1)
    if pad_elems:
        flat_x = jnp.pad(flat_x, (0, pad_elems))
        flat_t = jnp.pad(flat_t, (0, pad_elems))
    x2d = flat_x.reshape(rows_padded, _LANES)
    t2d = flat_t.reshape(rows_padded, _LANES)

    kernel = functools.partial(
        _focal_loss_kernel,
        gamma=float(gamma),
        sub_rows=sub,
        n_sub=n_sub,
        tile_rows=tile_rows,
        steps_per_chunk=steps_per_chunk,
        full_rows=n_total // _LANES,
        rem_lanes=n_total % _LANES,
        need_mask=(pad_elems != 0),
        approx_recip=bool(approx_reciprocal),
    )

    n_padded = rows_padded * _LANES
    in_bytes = x2d.size * x2d.dtype.itemsize + t2d.size * t2d.dtype.itemsize
    cost = pl.CostEstimate(
        flops=16 * n_padded,
        transcendentals=3 * n_padded,            # exp + log1p + reciprocal
        bytes_accessed=in_bytes + n_chunks * _FOLD * _LANES * 4,
    )

    blk_bytes = tile_rows * _LANES * (x2d.dtype.itemsize + t2d.dtype.itemsize)
    vmem_limit = int(min(100 * 1024 * 1024, max(32 * 1024 * 1024, 4 * blk_bytes)))

    partial_sums = pl.pallas_call(
        kernel,
        out_shape=jax.ShapeDtypeStruct((n_chunks * _FOLD, _LANES), jnp.float32),
        grid_spec=pltpu.PrefetchScalarGridSpec(
            num_scalar_prefetch=0,
            grid=(n_chunks, steps_per_chunk),
            in_specs=[
                pl.BlockSpec((tile_rows, _LANES),
                             lambda c, s: (c * steps_per_chunk + s, 0)),
                pl.BlockSpec((tile_rows, _LANES),
                             lambda c, s: (c * steps_per_chunk + s, 0)),
            ],
            out_specs=pl.BlockSpec((_FOLD, _LANES), lambda c, s: (c, 0)),
            scratch_shapes=[pltpu.VMEM((_FOLD, _LANES), jnp.float32)],
        ),
        compiler_params=pltpu.CompilerParams(
            dimension_semantics=("parallel", "arbitrary"),
            vmem_limit_bytes=vmem_limit,
        ),
        cost_estimate=cost,
    )(x2d, t2d)

    # One cross-lane reduce + one multiply by the precomputed weights/N, outside.
    return jnp.sum(partial_sums) * jnp.float32(w / n_total)


def focal_loss_ref(inputs, targets, *, weights=1.0, gamma=2.0):
    x = inputs.astype(jnp.float32)
    t = targets.astype(jnp.float32)
    bce = jnp.maximum(x, 0.0) - x * t + jnp.log1p(jnp.exp(-jnp.abs(x)))
    pt = jnp.exp(-bce)
    return jnp.mean(weights * (1.0 - pt) ** gamma * bce)


if __name__ == "__main__":
    key = jax.random.PRNGKey(0)
    k1, k2 = jax.random.split(key)

    # Multilabel-FCN style inputs: logits and {0,1} targets, NCHW [2, 4, 16, 16].
    shape = (2, 4, 16, 16)
    inputs = jax.random.normal(k1, shape, dtype=jnp.float32) * 2.0
    targets = (jax.random.uniform(k2, shape) > 0.5).astype(jnp.float32)

    loss = jax.block_until_ready(focal_loss(inputs, targets, weights=1.0, gamma=2.0))
    ref = focal_loss_ref(inputs, targets, weights=1.0, gamma=2.0)
    # Approximate EUP reciprocal (vrcp) is used for pt -> slightly loose tolerance.
    assert jnp.allclose(loss, ref, rtol=2e-3, atol=1e-5), (loss, ref)

    # Ragged shape (210 elements) exercises the pad-to-tile + tail-mask path; exact
    # reciprocal here to also validate the approx_reciprocal=False branch.
    shape2 = (2, 3, 7, 5)
    x2 = jax.random.normal(k1, shape2, dtype=jnp.float32) * 2.0
    t2 = (jax.random.uniform(k2, shape2) > 0.5).astype(jnp.float32)
    loss2 = jax.block_until_ready(
        focal_loss(x2, t2, weights=1.0, gamma=2.0, approx_reciprocal=False))
    ref2 = focal_loss_ref(x2, t2, weights=1.0, gamma=2.0)
    assert jnp.allclose(loss2, ref2, rtol=1e-5, atol=1e-7), (loss2, ref2)

    print("KERNEL_OK")
</pallas_src>

<mosaic_0001>
module attributes {stable_mosaic.version = 11 : i64} {
  func.func @_focal_loss_kernel(%arg0: i32, %arg1: i32, %arg2: memref<32x128xf32, #tpu.memory_space<vmem>>, %arg3: memref<32x128xf32, #tpu.memory_space<vmem>>, %arg4: memref<32x128xf32, #tpu.memory_space<vmem>>, %arg5: memref<32x128xf32, #tpu.memory_space<vmem>>) attributes {dimension_semantics = [#tpu.dimension_semantics<parallel>, #tpu.dimension_semantics<arbitrary>], iteration_bounds = array<i64: 1, 1>, scalar_prefetch = 0 : i64, scratch_operands = 1 : i64, tpu.core_type = #tpu.core_type<tc>, window_params = [{transform_indices = @transform_0, window_bounds = array<i64: 32, 128>}, {transform_indices = @transform_1, window_bounds = array<i64: 32, 128>}, {transform_indices = @transform_2, window_bounds = array<i64: 32, 128>}]} {
    %c0_i32 = arith.constant 0 : i32
    %0 = arith.cmpi eq, %arg1, %c0_i32 : i32
    %1 = arith.extui %0 : i1 to i32
    %c0_i32_0 = arith.constant 0 : i32
    %2 = arith.cmpi ne, %1, %c0_i32_0 : i32
    scf.if %2 {
      %cst_24 = arith.constant 0.000000e+00 : f32
      %60 = vector.broadcast %cst_24 : f32 to vector<32x128xf32>
      %c0_25 = arith.constant 0 : index
      %c0_26 = arith.constant 0 : index
      %61 = vector.load %arg5[%c0_25, %c0_26] : memref<32x128xf32, #tpu.memory_space<vmem>>, vector<32x128xf32>
      tpu.vector_store %arg5[%c0_25, %c0_26], %60 {strides = array<i32>} : memref<32x128xf32, #tpu.memory_space<vmem>>, vector<32x128xf32>,
    } else {
    }
    %c1_i32 = arith.constant 1 : i32
    %3 = arith.muli %arg0, %c1_i32 : i32
    %4 = arith.addi %3, %arg1 : i32
    %c32_i32 = arith.constant 32 : i32
    %5 = arith.muli %4, %c32_i32 : i32
    %6 = tpu.iota {dimensions = array<i32: 0>} : vector<32x128xi32>
    %7 = tpu.iota {dimensions = array<i32: 1>} : vector<32x128xi32>
    %c0 = arith.constant 0 : index
    %c0_1 = arith.constant 0 : index
    %8 = vector.load %arg2[%c0, %c0_1] : memref<32x128xf32, #tpu.memory_space<vmem>>, vector<32x128xf32>
    %c0_2 = arith.constant 0 : index
    %c0_3 = arith.constant 0 : index
    %9 = vector.load %arg3[%c0_2, %c0_3] : memref<32x128xf32, #tpu.memory_space<vmem>>, vector<32x128xf32>
    %cst = arith.constant 2.000000e+00 : f32
    %10 = vector.broadcast %cst : f32 to vector<32x128xf32>
    %11 = arith.mulf %10, %9 : vector<32x128xf32>
    %cst_4 = arith.constant 1.000000e+00 : f32
    %12 = vector.broadcast %cst_4 : f32 to vector<32x128xf32>
    %13 = arith.subf %11, %12 : vector<32x128xf32>
    %14 = arith.mulf %13, %8 : vector<32x128xf32>
    %15 = math.absf %14 : vector<32x128xf32>
    %cst_5 = arith.constant 0.000000e+00 : f32
    %16 = vector.broadcast %cst_5 : f32 to vector<32x128xf32>
    %17 = arith.subf %16, %15 : vector<32x128xf32>
    %18 = math.exp %17 : vector<32x128xf32>
    %cst_6 = arith.constant 0.000000e+00 : f32
    %19 = vector.broadcast %cst_6 : f32 to vector<32x128xf32>
    %20 = arith.subf %19, %14 : vector<32x128xf32>
    %cst_7 = arith.constant 0.000000e+00 : f32
    %21 = vector.broadcast %cst_7 : f32 to vector<32x128xf32>
    %22 = arith.maximumf %20, %21 : vector<32x128xf32>
    %23 = math.log1p %18 : vector<32x128xf32>
    %24 = arith.addf %22, %23 : vector<32x128xf32>
    %cst_8 = arith.constant 0.000000e+00 : f32
    %25 = vector.broadcast %cst_8 : f32 to vector<32x128xf32>
    %26 = arith.cmpf oge, %14, %25 : vector<32x128xf32>
    %cst_9 = arith.constant 1.000000e+00 : f32
    %27 = vector.broadcast %cst_9 : f32 to vector<32x128xf32>
    %28 = arith.select %26, %27, %18 : vector<32x128xi1>, vector<32x128xf32>
    %cst_10 = arith.constant 1.000000e+00 : f32
    %29 = vector.broadcast %cst_10 : f32 to vector<32x128xf32>
    %30 = arith.addf %29, %18 : vector<32x128xf32>
    %31 = tpu.reciprocal %30 {approx = true} : vector<32x128xf32> -> vector<32x128xf32>
    %32 = arith.mulf %28, %31 : vector<32x128xf32>
    %cst_11 = arith.constant 1.000000e+00 : f32
    %33 = vector.broadcast %cst_11 : f32 to vector<32x128xf32>
    %34 = arith.subf %33, %32 : vector<32x128xf32>
    %cst_12 = arith.constant 0.000000e+00 : f32
    %35 = vector.broadcast %cst_12 : f32 to vector<32x128xf32>
    %36 = arith.maximumf %34, %35 : vector<32x128xf32>
    %37 = arith.mulf %36, %36 : vector<32x128xf32>
    %38 = arith.mulf %37, %24 : vector<32x128xf32>
    %c0_i32_13 = arith.constant 0 : i32
    %39 = arith.addi %5, %c0_i32_13 : i32
    %40 = vector.broadcast %39 : i32 to vector<32x128xi32>
    %41 = arith.addi %6, %40 : vector<32x128xi32>
    %c16_i32 = arith.constant 16 : i32
    %42 = vector.broadcast %c16_i32 : i32 to vector<32x128xi32>
    %43 = arith.cmpi slt, %41, %42 : vector<32x128xi32>
    %c16_i32_14 = arith.constant 16 : i32
    %44 = vector.broadcast %c16_i32_14 : i32 to vector<32x128xi32>
    %45 = arith.cmpi eq, %41, %44 : vector<32x128xi32>
    %c0_i32_15 = arith.constant 0 : i32
    %46 = vector.broadcast %c0_i32_15 : i32 to vector<32x128xi32>
    %47 = arith.cmpi slt, %7, %46 : vector<32x128xi32>
    %48 = arith.andi %45, %47 : vector<32x128xi1>
    %49 = arith.ori %43, %48 : vector<32x128xi1>
    %cst_16 = arith.constant 0.000000e+00 : f32
    %50 = vector.broadcast %cst_16 : f32 to vector<32x128xf32>
    %51 = arith.select %49, %38, %50 : vector<32x128xi1>, vector<32x128xf32>
    %c0_17 = arith.constant 0 : index
    %c0_18 = arith.constant 0 : index
    %52 = vector.load %arg5[%c0_17, %c0_18] : memref<32x128xf32, #tpu.memory_space<vmem>>, vector<32x128xf32>
    %53 = vector.shape_cast %51 : vector<32x128xf32> to vector<1x32x128xf32>
    %cst_19 = arith.constant dense<0.000000e+00> : vector<32x128xf32>
    %54 = vector.multi_reduction <add>, %53, %cst_19 [0] : vector<1x32x128xf32> to vector<32x128xf32>
    %55 = arith.addf %52, %54 : vector<32x128xf32>
    %c0_20 = arith.constant 0 : index
    %c0_21 = arith.constant 0 : index
    %56 = vector.load %arg5[%c0_20, %c0_21] : memref<32x128xf32, #tpu.memory_space<vmem>>, vector<32x128xf32>
    tpu.vector_store %arg5[%c0_20, %c0_21], %55 {strides = array<i32>} : memref<32x128xf32, #tpu.memory_space<vmem>>, vector<32x128xf32>,
    %c0_i32_22 = arith.constant 0 : i32
    %57 = arith.cmpi eq, %arg1, %c0_i32_22 : i32
    %58 = arith.extui %57 : i1 to i32
    %c0_i32_23 = arith.constant 0 : i32
    %59 = arith.cmpi ne, %58, %c0_i32_23 : i32
    scf.if %59 {
      %c0_24 = arith.constant 0 : index
      %c0_25 = arith.constant 0 : index
      %60 = vector.load %arg5[%c0_24, %c0_25] : memref<32x128xf32, #tpu.memory_space<vmem>>, vector<32x128xf32>
      %c0_26 = arith.constant 0 : index
      %c0_27 = arith.constant 0 : index
      %61 = vector.load %arg4[%c0_26, %c0_27] : memref<32x128xf32, #tpu.memory_space<vmem>>, vector<32x128xf32>
      tpu.vector_store %arg4[%c0_26, %c0_27], %60 {strides = array<i32>} : memref<32x128xf32, #tpu.memory_space<vmem>>, vector<32x128xf32>,
    } else {
    }
    return
  }
  func.func @transform_0(%arg0: i32, %arg1: i32) -> (i32, i32) {
    %c1_i32 = arith.constant 1 : i32
    %0 = arith.muli %arg0, %c1_i32 : i32
    %1 = arith.addi %0, %arg1 : i32
    %c0_i32 = arith.constant 0 : i32
    %c0_i32_0 = arith.constant 0 : i32
    return %1, %c0_i32 : i32, i32
  }
  func.func @transform_1(%arg0: i32, %arg1: i32) -> (i32, i32) {
    %c1_i32 = arith.constant 1 : i32
    %0 = arith.muli %arg0, %c1_i32 : i32
    %1 = arith.addi %0, %arg1 : i32
    %c0_i32 = arith.constant 0 : i32
    %c0_i32_0 = arith.constant 0 : i32
    return %1, %c0_i32 : i32, i32
  }
  func.func @transform_2(%arg0: i32, %arg1: i32) -> (i32, i32) {
    %c0_i32 = arith.constant 0 : i32
    %c0_i32_0 = arith.constant 0 : i32
    return %arg0, %c0_i32 : i32, i32
  }
}

</mosaic_0001>

<bundles_post_ra>
// kernel: tpu_custom_call.1
= control target key start
LH: loop header
LB: loop body
LE: loop exit
PB: predicated region body
PF: predicated region fallthrough
CT: control target
= control target key end

     0   :  { %7 = vsyncpa [#allocation4], 0  ;;  %s426_s0 = inlined_call_operand.hbm [shape: f32[32,128], index: 0, kind: input, shape index: {}]   ;;  %s427_s1 = inlined_call_operand.hbm [shape: f32[32,128], index: 1, kind: input, shape index: {}]   ;;  %s428_s2 = inlined_call_operand.hbm [shape: f32[32,128], index: 2, kind: output, shape index: {}]  }
   0x1   :  { %8 = vsyncpa [#allocation7], 0 }
   0x2   :  { %9 = vsyncpa [#allocation5], 0  ;;  %s354_s9 = smov [#allocation3]   ;;  %s282_s13 = scalar_lea.hbm %s426_s0, 512 }
   0x3   :  { %s19_s10 = sshll.u32 %s354_s9, 4  ;;  %p283_p0 = scmp.ne.s32.totalorder %s426_s0, %s282_s13  ;;  %s20_s10 = int_to_ptr.vmem [resolvable:$true] %s19_s10 }
   0x4   :  { %p286_p1 = scmp.lt.u32.totalorder %s282_s13, %s426_s0 }
   0x6   :  { %p288_p2 = pnand %p286_p1, %p283_p0 }
   0x8   :  { %291 = shalt.err (!%p288_p2)
}
   0x9   :  { %s292_s18 = scalar_lea.vmem %s20_s10, 512  ;;  %p297_p4 = scmp.lt.s32.totalorder %s20_s10, %s20_s10 }
   0xa   :  { %p293_p3 = scmp.ne.s32.totalorder %s20_s10, %s292_s18  ;;  %p298_p5 = scmp.lt.s32.totalorder %s292_s18, %s292_s18 }
   0xc   :  { %p299_p6 = por %p298_p5, %p297_p4 }
   0xe   :  { %p300_p7 = pnand %p299_p6, %p293_p3 }
  0x10   :  { %303 = shalt.err (!%p300_p7)
}
  0x11   :  { %s355_s19 = smov 128   ;;  %s356_s20 = smov 8  }
  0x12   :  { %25 = dma.hbm_to_vmem [thread:$0]  %s426_s0, 512, %s20_s10, [#allocation4], %s355_s19, %s355_s19, %s356_s20  }
  0x13   :  { %s357_s23 = smov [#allocation6]   ;;  %s304_s27 = scalar_lea.hbm %s427_s1, 512 }
  0x14   :  { %s35_s24 = sshll.u32 %s357_s23, 4  ;;  %p305_p8 = scmp.ne.s32.totalorder %s427_s1, %s304_s27  ;;  %s36_s24 = int_to_ptr.vmem [resolvable:$true] %s35_s24 }
  0x15   :  { %p308_p9 = scmp.lt.u32.totalorder %s304_s27, %s427_s1 }
  0x17   :  { %p310_p10 = pnand %p308_p9, %p305_p8 }
  0x19   :  { %313 = shalt.err (!%p310_p10)
}
  0x1a   :  { %s314_s4 = scalar_lea.vmem %s36_s24, 512  ;;  %p319_p12 = scmp.lt.s32.totalorder %s36_s24, %s36_s24 }
  0x1b   :  { %p315_p11 = scmp.ne.s32.totalorder %s36_s24, %s314_s4  ;;  %p320_p13 = scmp.lt.s32.totalorder %s314_s4, %s314_s4 }
  0x1d   :  { %p321_p0 = por %p320_p13, %p319_p12 }
  0x1f   :  { %p322_p1 = pnand %p321_p0, %p315_p11 }
  0x21   :  { %325 = shalt.err (!%p322_p1)
}
  0x22   :  { %41 = dma.hbm_to_vmem [thread:$0]  %s427_s1, 512, %s36_s24, [#allocation7], %s355_s19, %s355_s19, %s356_s20  }
  0x23   :  { %348 = dma.done.wait [#allocation4], 512  }
  0x24   :  { %349 = vsyncadd [#allocation4], 4294966784 }
  0x25   :  { %350 = dma.done.wait [#allocation7], 512  }
  0x26   :  { %351 = vsyncadd [#allocation7], 4294966784  ;;  %v358_v0 = vmov 0.0   ;;  %v73_v1 = vld [vmem:[#allocation6] sm:$0xff]  ;;  %v74_v3 = vld [vmem:[#allocation6 + $0x8] sm:$0xff]  ;;  %s359_s1 = smov [#allocation8]  }
  0x27   :  { %240 = vst [vmem:[#allocation8 + $0x10] sm:$0xff] %v358_v0  ;;  %241 = vst [vmem:[#allocation8 + $0x18] sm:$0xff] %v358_v0  ;;  %v77_v2 = vmul.f32 2.0, %v73_v1  ;;  %v69_v4 = vld [vmem:[#allocation3] sm:$0xff]  ;;  %v78_v5 = vmul.f32 2.0, %v74_v3  ;;  %v70_v7 = vld [vmem:[#allocation3 + $0x8] sm:$0xff] }
  0x28   :  { %s247_s6 = sshll.u32 %s359_s1, 4  ;;  %s248_s6 = int_to_ptr.vmem [resolvable:$true] %s247_s6 }
  0x29   :  { %v260_v6 = vadd.f32 -1.0, %v77_v2  ;;  %v261_v8 = vadd.f32 -1.0, %v78_v5  ;;  %s326_s7 = scalar_lea.vmem %s248_s6, 512  ;;  %p331_p3 = scmp.lt.s32.totalorder %s248_s6, %s248_s6 }
  0x2a   :  { %p327_p2 = scmp.ne.s32.totalorder %s248_s6, %s326_s7  ;;  %p332_p4 = scmp.lt.s32.totalorder %s326_s7, %s326_s7 }
  0x2b   :  { %v85_v9 = vmul.f32 %v260_v6, %v69_v4  ;;  %v86_v10 = vmul.f32 %v261_v8, %v70_v7 }
  0x2c   :  { %p333_p5 = por %p332_p4, %p331_p3 }
  0x2d   :  { %v89_v11 = vand.u32 2147483647, %v85_v9  ;;  %v90_v12 = vand.u32 2147483647, %v86_v10  ;;  %vm153_vm0 = vcmp.ge.f32.partialorder %v85_v9, 0.0  ;;  %v105_v26 = vsub.f32 0.0, %v85_v9 }
  0x2e   :  { %vm154_vm1 = vcmp.ge.f32.partialorder %v86_v10, 0.0  ;;  %v106_v32 = vsub.f32 0.0, %v86_v10  ;;  %p334_p6 = pnand %p333_p5, %p327_p2 }
  0x2f   :  { %v93_v13 = vsub.f32 0.0, %v89_v11  ;;  %v94_v14 = vsub.f32 0.0, %v90_v12  ;;  %v109_v38 = vmax.f32 %v105_v26, 0.0 }
  0x30   :  { %v110_v44 = vmax.f32 %v106_v32, 0.0 }
  0x31   :  { %v97_v15 = vmul.f32 1.442695, %v93_v13  ;;  %v99_v16 = vmul.f32 1.442695, %v94_v14 }
  0x33   :  { %270 = vpow2.f32 %v97_v15 }
  0x34   :  { %272 = vpow2.f32 %v99_v16 }
  0x3d   :  { %v271_v17 = vpop.eup %270 }
  0x3e   :  { %v273_v18 = vpop.eup %272  ;;  %v113_v19 = vadd.f32 1.0, %v271_v17  ;;  %v116_v21 = vmul.f32 -0.5, %v271_v17  ;;  %v119_v24 = vand.u32 2147483647, %v271_v17  ;;  %v157_v29 = vsel %vm153_vm0, 1.0, %v271_v17 }
  0x3f   :  { %v122_v20 = vadd.f32 1.0, %v273_v18  ;;  %v125_v22 = vmul.f32 -0.5, %v273_v18  ;;  %v128_v27 = vand.u32 2147483647, %v273_v18  ;;  %v158_v36 = vsel %vm154_vm1, 1.0, %v273_v18 }
  0x40   :  { %274 = vlog2.f32 %v113_v19  ;;  %v117_v23 = vadd.f32 1.0, %v116_v21  ;;  %vm405_vm2 = vcmp.lt.f32.partialorder %v119_v24, 0.0004427343 }
  0x41   :  { %276 = vrcp.f32 %v113_v19  ;;  %v126_v25 = vadd.f32 1.0, %v125_v22  ;;  %vm129_vm3 = vcmp.lt.f32.partialorder %v128_v27, 0.0004427343 }
  0x42   :  { %278 = vlog2.f32 %v122_v20  ;;  %v118_v28 = vmul.f32 %v271_v17, %v117_v23 }
  0x43   :  { %280 = vrcp.f32 %v122_v20  ;;  %v127_v35 = vmul.f32 %v273_v18, %v126_v25 }
  0x4a   :  { %v275_v30 = vpop.eup %274 }
  0x4b   :  { %v277_v33 = vpop.eup %276  ;;  %v115_v34 = vmul.f32 0.6931472, %v275_v30 }
  0x4c   :  { %v279_v37 = vpop.eup %278  ;;  %v169_v39 = vmul.f32 %v277_v33, %v157_v29 }
  0x4d   :  { %v281_v40 = vpop.eup %280  ;;  %v121_v41 = vsel %vm405_vm2, %v118_v28, %v115_v34  ;;  %v124_v42 = vmul.f32 0.6931472, %v279_v37 }
  0x4e   :  { %v173_v43 = vsub.f32 1.0, %v169_v39  ;;  %v170_v45 = vmul.f32 %v281_v40, %v158_v36  ;;  %v149_v47 = vadd.f32 %v121_v41, %v109_v38 }
  0x4f   :  { %v130_v46 = vsel %vm129_vm3, %v127_v35, %v124_v42 }
  0x50   :  { %v177_v48 = vmax.f32 %v173_v43, 0.0  ;;  %v174_v49 = vsub.f32 1.0, %v170_v45  ;;  %v150_v51 = vadd.f32 %v130_v46, %v110_v44 }
  0x52   :  { %v181_v50 = vmul.f32 %v177_v48, %v177_v48  ;;  %v178_v52 = vmax.f32 %v174_v49, 0.0 }
  0x54   :  { %v185_v53 = vmul.f32 %v181_v50, %v149_v47  ;;  %v182_v54 = vmul.f32 %v178_v52, %v178_v52 }
  0x56   :  { %238 = vst [vmem:[#allocation8] sm:$0xff] %v185_v53  ;;  %v186_v55 = vmul.f32 %v182_v54, %v150_v51 }
  0x58   :  { %239 = vst [vmem:[#allocation8 + $0x8] sm:$0xff] %v186_v55 }
  0x59   :  { %337 = shalt.err (!%p334_p6)
}
  0x5a   :  { %s338_s10 = scalar_lea.hbm %s428_s2, 512 }
  0x5b   :  { %p339_p7 = scmp.ne.s32.totalorder %s428_s2, %s338_s10  ;;  %p342_p8 = scmp.lt.u32.totalorder %s338_s10, %s428_s2 }
  0x5d   :  { %p344_p9 = pnand %p342_p8, %p339_p7 }
  0x5f   :  { %347 = shalt.err (!%p344_p9)
}
  0x60   :  { %253 = dma.vmem_to_hbm [thread:$0]  %s248_s6, 512, %s428_s2, [#allocation5], %s355_s19, %s355_s19, %s356_s20  }
  0x61   :  { %352 = dma.done.wait [#allocation5], 512  }
  0x62   :  { %353 = vsyncadd [#allocation5], 4294966784 }
  0x63   :  { %257 = vsyncpa [#allocation4], 1 }
  0x64   :  { %258 = vsyncpa [#allocation7], 1 }
  0x65   :  { %259 = vsyncpa [#allocation5], 1 }

</bundles_post_ra>
